<compile_context>
chip_gen: v6e
topology: v6e:2x2x1
jax: 0.10.0
libtpu: 0.0.40
codegen_flags: <defaults>
</compile_context>

<pallas_src>
import numpy as np
import jax
import jax.numpy as jnp
from jax.experimental import pallas as pl
from jax.experimental.pallas import tpu as pltpu


# --------------------------------- kernel ------------------------------------

def _add_pe_kernel(x_ref, pe_ref, o_ref):
    # x block: (bt, rb); pe block: (1, rb) -> broadcast over the batch rows.
    o_ref[...] = x_ref[...] + pe_ref[...]


# ------------------------------ module setup ----------------------------------

def make_positional_table(max_seq_length, width):
    """Exact replica of the PyTorch __init__ loop (sin on even i, cos on odd)."""
    pos = np.arange(max_seq_length, dtype=np.float32)[:, None]
    i = np.arange(width, dtype=np.float32)[None, :]
    even = (np.arange(width)[None, :] % 2) == 0
    pe = np.where(even,
                  np.sin(pos / 10000.0 ** (i / width)),
                  np.cos(pos / 10000.0 ** ((i - 1.0) / width)))
    return jnp.asarray(pe[None], dtype=jnp.float32)            # (1, S, W)


# ------------------------------ tiling helpers ---------------------------------

def _cdiv(a, b):
    return (a + b - 1) // b


def _round_up(a, m):
    return _cdiv(a, m) * m


def _sublane_multiple(dtype):
    """Dtype-native sublane packing multiple: 8 (f32), 16 (bf16), 32 (i8/fp8)."""
    return max(8, 32 // jnp.dtype(dtype).itemsize)


def _pick_tiles(B, R, itemsize, sublane, tile_budget_bytes):
    """Pick the (bt, rb) block for the folded (B, R) layout.

    Legality: bt must be a multiple of `sublane` or equal B; rb must be a
    multiple of 128 or equal R.  The *x tile* targets <= tile_budget_bytes;
    the true VMEM footprint is ~4x that (double-buffered x + out) plus pe,
    which the caller accounts for via vmem_limit_bytes.
    """
    row_bytes = R * itemsize

    if row_bytes <= tile_budget_bytes:
        # A full folded row fits: take whole rows, as many as the budget allows.
        rb = R
        max_rows = max(1, tile_budget_bytes // row_bytes)
        if B <= max_rows or B <= sublane:
            bt = B
        else:
            bt = max(sublane, (max_rows // sublane) * sublane)
    else:
        # Row too big for one tile: tile the lane dimension (needs R % 128 == 0).
        bt = B if B <= sublane else sublane
        if R % 128 == 0:
            rb = max(128, (tile_budget_bytes // (bt * itemsize) // 128) * 128)
            rb = min(R, rb)
        else:
            # TODO(synk): huge row that is not a multiple of 128 cannot be
            # legally lane-tiled; take the full row and an oversized tile.
            rb = R

    # v7x has two TensorCores; "parallel" can only split a grid with >= 2
    # steps across them, so avoid a single-step grid whenever the shape allows.
    if _cdiv(B, bt) * _cdiv(R, rb) == 1:
        if R % 128 == 0 and R >= 256:
            rb = _cdiv(R // 128, 2) * 128          # split the row axis ~in half
        elif B > sublane:
            bt = min(B, _round_up(_cdiv(B, 2), sublane))

    return bt, rb


# ------------------------------- forward pass ---------------------------------

def positional_embedding_forward(x, pe, *, tile_budget_bytes=4 << 20,
                                 donate_x=False):
    """forward(x) = x + pe   (x: (B, S, W), pe: (1, S, W))."""
    B, S, W = x.shape
    assert pe.shape == (1, S, W), (pe.shape, x.shape)

    dtype = x.dtype
    itemsize = jnp.dtype(dtype).itemsize
    sublane = _sublane_multiple(dtype)
    R = S * W

    # Lane-dense folded layout (row-major, so the reshape is a free bitcast).
    x2 = x.reshape(B, R)
    pe2 = pe.astype(dtype).reshape(1, R)       # match activation dtype

    bt, rb = _pick_tiles(B, R, itemsize, sublane, tile_budget_bytes)
    nb, nr = _cdiv(B, bt), _cdiv(R, rb)

    # Real footprint: double-buffered x tile + double-buffered out tile +
    # double-buffered pe block + headroom for compiler-internal scratch.
    tile_bytes = bt * rb * itemsize
    pe_tile_bytes = rb * itemsize
    vmem_limit = max(16 << 20, 4 * tile_bytes + 2 * pe_tile_bytes + (2 << 20))

    cost = pl.CostEstimate(flops=B * R, transcendentals=0,
                           bytes_accessed=(2 * B + 1) * R * itemsize)

    extra = {"input_output_aliases": {0: 0}} if donate_x else {}

    out = pl.pallas_call(
        _add_pe_kernel,
        out_shape=jax.ShapeDtypeStruct((B, R), dtype),
        # Row-block outer, batch-block inner: pe's block index is constant
        # across the inner loop, so its DMA is skipped on repeats.
        grid=(nr, nb),
        in_specs=[pl.BlockSpec((bt, rb), lambda r, b: (b, r)),
                  pl.BlockSpec((1, rb), lambda r, b: (0, r))],
        out_specs=pl.BlockSpec((bt, rb), lambda r, b: (b, r)),
        compiler_params=pltpu.CompilerParams(
            dimension_semantics=("parallel", "parallel"),
            vmem_limit_bytes=int(vmem_limit)),
        cost_estimate=cost,
        **extra,
    )(x2, pe2)
    return out.reshape(B, S, W)


# ----------------------------------- main --------------------------------------

if __name__ == "__main__":
    # Shapes implied by the module: x is (batch, seq, width), pe is (1, seq, width).
    width, max_seq_length, batch = 32, 8, 2

    key = jax.random.PRNGKey(0)
    x = jax.random.normal(key, (batch, max_seq_length, width), jnp.float32)
    pe = make_positional_table(max_seq_length, width)

    out = jax.block_until_ready(positional_embedding_forward(x, pe))
    ref = x + pe
    assert out.shape == (batch, max_seq_length, width), out.shape
    assert bool(jnp.all(jnp.isfinite(out)))
    assert bool(jnp.allclose(out, ref, atol=1e-6, rtol=1e-6))

    # Row length not a multiple of 128 (S*W = 100): folded layout with the
    # full-row block (only the final lane tile of each row is masked).
    x2 = jax.random.normal(jax.random.PRNGKey(1), (3, 5, 20), jnp.float32)
    pe2 = make_positional_table(5, 20)
    out2 = jax.block_until_ready(positional_embedding_forward(x2, pe2))
    assert bool(jnp.allclose(out2, x2 + pe2, atol=1e-6, rtol=1e-6))

    # bf16 activations: pe is cast to bf16 inside the wrapper (half the pe DMA
    # bytes, no dtype mismatch at the output store).
    x3 = jax.random.normal(jax.random.PRNGKey(2), (4, 8, 32), jnp.bfloat16)
    out3 = jax.block_until_ready(positional_embedding_forward(x3, pe))
    ref3 = x3 + pe.astype(jnp.bfloat16)
    assert out3.dtype == jnp.bfloat16
    assert bool(jnp.allclose(out3.astype(jnp.float32), ref3.astype(jnp.float32),
                             atol=1e-2, rtol=1e-2))

    print("KERNEL_OK")
</pallas_src>

<mosaic_0001>
module attributes {stable_mosaic.version = 11 : i64} {
  func.func @_add_pe_kernel(%arg0: i32, %arg1: i32, %arg2: memref<2x128xf32, #tpu.memory_space<vmem>>, %arg3: memref<1x128xf32, #tpu.memory_space<vmem>>, %arg4: memref<2x128xf32, #tpu.memory_space<vmem>>) attributes {dimension_semantics = [#tpu.dimension_semantics<parallel>, #tpu.dimension_semantics<parallel>], iteration_bounds = array<i64: 2, 1>, scalar_prefetch = 0 : i64, scratch_operands = 0 : i64, tpu.core_type = #tpu.core_type<tc>, window_params = [{transform_indices = @transform_0, window_bounds = array<i64: 2, 128>}, {transform_indices = @transform_1, window_bounds = array<i64: 1, 128>}, {transform_indices = @transform_2, window_bounds = array<i64: 2, 128>}]} {
    %c0 = arith.constant 0 : index
    %c0_0 = arith.constant 0 : index
    %0 = vector.load %arg2[%c0, %c0_0] : memref<2x128xf32, #tpu.memory_space<vmem>>, vector<2x128xf32>
    %c0_1 = arith.constant 0 : index
    %c0_2 = arith.constant 0 : index
    %1 = vector.load %arg3[%c0_1, %c0_2] : memref<1x128xf32, #tpu.memory_space<vmem>>, vector<1x128xf32>
    %2 = vector.broadcast %1 : vector<1x128xf32> to vector<2x128xf32>
    %3 = arith.addf %0, %2 : vector<2x128xf32>
    %c0_3 = arith.constant 0 : index
    %c0_4 = arith.constant 0 : index
    %4 = vector.load %arg4[%c0_3, %c0_4] : memref<2x128xf32, #tpu.memory_space<vmem>>, vector<2x128xf32>
    tpu.vector_store %arg4[%c0_3, %c0_4], %3 {strides = array<i32>} : memref<2x128xf32, #tpu.memory_space<vmem>>, vector<2x128xf32>,
    return
  }
  func.func @transform_0(%arg0: i32, %arg1: i32) -> (i32, i32) {
    %c0_i32 = arith.constant 0 : i32
    return %arg1, %arg0 : i32, i32
  }
  func.func @transform_1(%arg0: i32, %arg1: i32) -> (i32, i32) {
    %c0_i32 = arith.constant 0 : i32
    %c0_i32_0 = arith.constant 0 : i32
    return %c0_i32, %arg0 : i32, i32
  }
  func.func @transform_2(%arg0: i32, %arg1: i32) -> (i32, i32) {
    %c0_i32 = arith.constant 0 : i32
    return %arg1, %arg0 : i32, i32
  }
}

</mosaic_0001>

<bundles_post_ra>
// kernel: tpu_custom_call.1
= control target key start
LH: loop header
LB: loop body
LE: loop exit
PB: predicated region body
PF: predicated region fallthrough
CT: control target
= control target key end

     0   :  { %7 = vsyncpa [#allocation3], 0  ;;  %s745_s0 = inlined_call_operand.hbm [shape: f32[2,256], index: 0, kind: input, shape index: {}]   ;;  %s746_s1 = inlined_call_operand.hbm [shape: f32[1,256], index: 1, kind: input, shape index: {}]   ;;  %s747_s2 = inlined_call_operand.hbm [shape: f32[2,256], index: 2, kind: output, shape index: {}]  }
   0x1   :  { %9 = vsyncpa [#allocation3 + $0x1], 0 }
   0x2   :  { %10 = vsyncpa [#allocation6], 0 }
   0x3   :  { %12 = vsyncpa [#allocation6 + $0x1], 0 }
   0x4   :  { %13 = vsyncpa [#allocation4], 0 }
   0x5   :  { %15 = vsyncpa [#allocation4 + $0x1], 0  ;;  %s581_s9 = smov 0   ;;  %s583_s10 = smov 0  }
   0x6   :  { %s585_s11 = smov 0   ;;  %s587_s12 = smov 0  }
   0x7   :  { %s589_s13 = smov 0   ;;  %s591_s14 = smov 0  }
   0x8 LB: > { %s339_s15 = sadd.s32 4294967295, %s561_s14   ;;  %s340_s16 = sadd.s32 4294967294, %s561_s14   ;;  %s561_s14 = sphi %s591_s14, %s21_s14   ;;  %s557_s13 = sphi %s589_s13, %s759_s13   ;;  %s553_s12 = sphi %s587_s12, %s758_s12   ;;  %s549_s11 = sphi %s585_s11, %s757_s11   ;;  %s545_s10 = sphi %s583_s10, %s756_s10   ;;  %s541_s9 = sphi %s581_s9, %s755_s9  }
   0x9   : > { %s33_s17 = sadd.s32 1, %s557_s13  ;;  %s42_s18 = sadd.s32 1, %s549_s11 }
   0xa   : > { %p35_p0 = scmp.ge.s32.totalorder %s33_s17, 2  ;;  %p49_p1 = scmp.ne.s32.totalorder %s549_s11, %s545_s10 }
   0xb   : > { %p50_p2 = scmp.eq.s32.totalorder %s561_s14, 0  ;;  %p55_p3 = scmp.ne.s32.totalorder %s545_s10, %s541_s9 }
   0xc   : > { %s761_s17 = smov (%p35_p0, %s33_s17), 0  ;;  %p56_p5 = scmp.eq.s32.totalorder %s339_s15, 0 }
   0xd   : > { %p622_p4 = por %p50_p2, %p49_p1  ;;  %s38_s20 = ssub.s32 %s557_s13, %s761_s17 }
   0xe   : > { %p107_p6 = scmp.eq.s32.totalorder %s339_s15, 1  ;;  %p40_p7 = scmp.eq.s32.totalorder %s38_s20, 0 }
   0xf   : > { %p628_p8 = por %p56_p5, %p55_p3  ;;  %p113_p10 = scmp.eq.s32.totalorder %s340_s16, 1 }
  0x10   : > { %p632_p9 = por %p107_p6, %p49_p1  ;;  %p371_p13 = scmp.lt.s32.totalorder %s561_s14, 2 }
  0x11   : > { %s637_s23 = scalar_select %p40_p7, %s549_s11, %s42_s18  }
  0x12   : > { %p639_p11 = por %p113_p10, %p55_p3  ;;  %s646_s25 = sand.u32 1, %s549_s11  }
  0x13   : > { %s343_s26 = sshll.u32 %s646_s25, 1  ;;  %s344_s27 = sshll.u32 %s557_s13, 5 }
  0x14   : > { %s144_s30 = scalar_lea.hbm %s745_s0, %s344_s27  ;;  %s137_s3 = scalar_lea.vmem [#allocation2], %s343_s26 }
  0x15   : > { %s146_s4 = sshll.u32 %s137_s3, 4  ;;  %p655_p0 = pnand %p371_p13, %p622_p4  ;;  %s147_s4 = int_to_ptr.vmem [resolvable:$true] %s146_s4 }
  0x16   : > { %p346_p1 = scmp.ge.s32.totalorder %s561_s14, 1  ;;  %p168_p2 = scmp.lt.s32.totalorder %s561_s14, 3 }
  0x17   : > { %s134_s6 = scalar_lea.sflag [#allocation3], %s646_s25  ;;  %p423_p3 = pneg %p655_p0 }
  0x18   : > { %s434_s7 = scalar_lea.vmem %s147_s4, 32  ;;  %s563_s8 = smov [#allocation2]  }
  0x19   : > { %p435_p5 = scmp.ne.s32.totalorder %s147_s4, %s434_s7  ;;  %s439_s15 = sshll.u32 %s563_s8, 4  ;;  %s440_s15 = int_to_ptr.vmem [resolvable:$false] %s439_s15 }
  0x1a   : > { %s441_s16 = scalar_lea.vmem %s440_s15, 64  ;;  %p442_p4 = scmp.lt.s32.totalorder %s147_s4, %s440_s15 }
  0x1b   : > { %p437_p6 = pnand %p435_p5, %p423_p3  ;;  %p443_p10 = scmp.lt.s32.totalorder %s441_s16, %s434_s7 }
  0x1d   : > { %p438_p7 = pneg %p437_p6  ;;  %p444_p13 = por %p443_p10, %p442_p4 }
  0x1f   : > { %p445_p12 = pnand %p444_p13, %p438_p7 }
  0x21   : > { %448 = shalt.err (!%p445_p12)
}
  0x22   : > { %363 = dma.hbm_to_vmem [thread:$0]  (!%p655_p0), %s144_s30, 32, %s147_s4, %s134_s6  }
  0x23   : > { %p673_p5 = pnand %p346_p1, %p168_p2  ;;  %s345_s19 = sshll.u32 %s557_s13, 4 }
  0x24   : > { %s156_s20 = scalar_lea.vmem [#allocation5], %s646_s25  ;;  %s161_s29 = scalar_lea.hbm %s746_s1, %s345_s19 }
  0x25   : > { %s163_s26 = sshll.u32 %s156_s20, 4  ;;  %s154_s3 = scalar_lea.sflag [#allocation6], %s646_s25  ;;  %s164_s26 = int_to_ptr.vmem [resolvable:$true] %s163_s26 }
  0x26   : > { %s462_s7 = scalar_lea.vmem %s164_s26, 16  ;;  %s564_s30 = smov [#allocation5]  }
  0x27   : > { %p463_p12 = scmp.ne.s32.totalorder %s164_s26, %s462_s7  ;;  %s467_s4 = sshll.u32 %s564_s30, 4  ;;  %s468_s4 = int_to_ptr.vmem [resolvable:$false] %s467_s4 }
  0x28   : > { %s469_s6 = scalar_lea.vmem %s468_s4, 32  ;;  %p470_p1 = scmp.lt.s32.totalorder %s164_s26, %s468_s4 }
  0x29   : > { %p465_p6 = pnand %p463_p12, %p423_p3  ;;  %p471_p2 = scmp.lt.s32.totalorder %s469_s6, %s462_s7 }
  0x2b   : > { %p466_p7 = pneg %p465_p6  ;;  %p472_p4 = por %p471_p2, %p470_p1 }
  0x2d   : > { %p473_p10 = pnand %p472_p4, %p466_p7 }
  0x2f   : > { %476 = shalt.err (!%p473_p10)
}
  0x30   : > { %366 = dma.hbm_to_vmem [thread:$0]  (!%p655_p0), %s161_s29, 16, %s164_s26, %s154_s3  }
  0x31   : > { %172 = sbr.rel (%p673_p5) target bundleno = 81 (0x51), region = 28  ;;  %s691_s25 = sand.u32 (!%p673_p5), 1, %s545_s10  }
  0x32   : > { %s347_s8 = sshll.u32 (!%p673_p5), %s691_s25, 1  ;;  %s175_s15 = scalar_lea.sflag (!%p673_p5), [#allocation3], %s691_s25 }
  0x33   : > { %s178_s16 = scalar_lea.vmem (!%p673_p5), [#allocation2], %s347_s8 }
  0x36   : > { %528 = dma.done.wait (%p628_p8), %s175_s15, 32  }
  0x37   : > { %530 = vsyncadd (%p628_p8), %s175_s15, 4294967264  ;;  %s184_s5 = scalar_lea.sflag [#allocation6], %s691_s25  ;;  %s186_s18 = scalar_lea.vmem [#allocation5], %s691_s25 }
  0x38   : > { %532 = dma.done.wait (%p628_p8), %s184_s5, 16  }
  0x39   : > { %534 = vsyncadd (%p628_p8), %s184_s5, 4294967280  ;;  %s210_s19 = scalar_lea.vmem [#allocation7], %s347_s8  ;;  %s351_s26 = sshll.u32 %s553_s12, 5  ;;  %v211_v0 = vld [vmem:[%s178_s16] sm:$0x3] }
  0x3a   : > { %s237_s20 = sshll.u32 %s210_s19, 4  ;;  %v349_v1 = vld [vmem:[%s186_s18] ss:$0 sm:$0xff]  ;;  %s235_s29 = scalar_lea.hbm %s747_s2, %s351_s26  ;;  %s238_s20 = int_to_ptr.vmem [resolvable:$true] %s237_s20 }
  0x3b   : > { %v219_v2 = vadd.f32 %v349_v1, %v211_v0  ;;  %s222_s3 = scalar_lea.sflag [#allocation4], %s691_s25  ;;  %s477_s7 = scalar_lea.vmem %s238_s20, 32 }
  0x3c   : > { %p478_p0 = scmp.ne.s32.totalorder %s238_s20, %s477_s7  ;;  %s565_s21 = smov [#allocation7]  }
  0x3d   : > { %220 = vst [vmem:[%s210_s19] sm:$0x3] %v219_v2  ;;  %s481_s30 = sshll.u32 %s565_s21, 4  ;;  %s482_s30 = int_to_ptr.vmem [resolvable:$false] %s481_s30 }
  0x3e   : > { %p479_p8 = pnand %p478_p0, %p632_p9  ;;  %s483_s4 = scalar_lea.vmem %s482_s30, 64 }
  0x3f   : > { %p484_p13 = scmp.lt.s32.totalorder %s238_s20, %s482_s30  ;;  %p485_p5 = scmp.lt.s32.totalorder %s483_s4, %s477_s7 }
  0x40   : > { %p480_p3 = pneg %p479_p8 }
  0x41   : > { %p486_p12 = por %p485_p5, %p484_p13 }
  0x43   : > { %p487_p6 = pnand %p486_p12, %p480_p3 }
  0x45   : > { %490 = shalt.err (!%p487_p6)
}
  0x46   : > { %s491_s12 = scalar_lea.hbm %s235_s29, 32  ;;  %s495_s8 = scalar_lea.hbm %s747_s2, 64 }
  0x47   : > { %p492_p7 = scmp.ne.s32.totalorder %s235_s29, %s491_s12  ;;  %p496_p4 = scmp.lt.s32.totalorder %s235_s29, %s747_s2 }
  0x48   : > { %p497_p10 = scmp.lt.s32.totalorder %s495_s8, %s491_s12 }
  0x49   : > { %p493_p1 = pnand %p492_p7, %p632_p9 }
  0x4a   : > { %p498_p0 = por %p497_p10, %p496_p4 }
  0x4b   : > { %p494_p2 = pneg %p493_p1 }
  0x4d   : > { %p499_p8 = pnand %p498_p0, %p494_p2 }
  0x4f   : > { %502 = shalt.err (!%p499_p8)
}
  0x50   : > { %358 = dma.vmem_to_hbm [thread:$0]  (%p632_p9), %s238_s20, 32, %s235_s29, %s222_s3  }
  0x51 PF: > { %s249_s5 = sand.u32 1, %s541_s9   ;;  %p754_p3 = scmp.ge.s32.totalorder %s561_s14, 2 }
  0x52   : > { %s250_s18 = scalar_lea.sflag [#allocation4], %s249_s5 }
  0x53   : > { %p368_p13 = pnand %p754_p3, %p639_p11 }
  0x55   : > { %p369_p5 = pneg %p368_p13 }
  0x57   : > { %536 = dma.done.wait (%p369_p5), %s250_s18, 32  }
  0x58   : > { %538 = vsyncadd (%p369_p5), %s250_s18, 4294967264  ;;  %s21_s14 = sadd.s32 1, %s561_s14   ;;  %s755_s9 = smov %s545_s10 }
  0x59   : > { %p18_p12 = scmp.ge.s32.totalorder %s21_s14, 4   ;;  %s756_s10 = smov %s549_s11 }
  0x5a   : > { %s757_s11 = smov %s637_s23  ;;  %s758_s12 = smov %s557_s13 }
  0x5b   : > { %s759_s13 = smov %s761_s17  ;;  %20 = sbr.rel (!%p18_p12) target bundleno = 8 (0x8), region = 86 }
  0x60   :  { %255 = vsyncpa [#allocation3], 1 }
  0x61   :  { %257 = vsyncpa [#allocation3 + $0x1], 1 }
  0x62   :  { %258 = vsyncpa [#allocation6], 1 }
  0x63   :  { %260 = vsyncpa [#allocation6 + $0x1], 1 }
  0x64   :  { %261 = vsyncpa [#allocation4], 1 }
  0x65   :  { %263 = vsyncpa [#allocation4 + $0x1], 1 }

</bundles_post_ra>
